<compile_context>
chip_gen: v6e
topology: v6e:2x2x1
jax: 0.10.0
libtpu: 0.0.40
codegen_flags: <defaults>
</compile_context>

<pallas_src>
import functools
import math

import jax
import jax.numpy as jnp
from jax import lax
from jax.experimental import pallas as pl
from jax.experimental.pallas import tpu as pltpu


def _sigmoid(x):
    # sigmoid(x) = 0.5 * (tanh(x/2) + 1): keeps the transcendental on the EUP
    # slot and avoids an f32 divide on the VALU.
    return 0.5 * (jnp.tanh(0.5 * x) + 1.0)


def _lstm_dir_kernel(len_ref, xg_ref, whh_ref, out_ref, hfin_ref, *, seq_len, hidden):
    """One direction of one LSTM layer; full time loop inside the kernel.

    Refs (leading direction axis already squeezed by the BlockSpecs):
      len_ref : (B, 1)  int32   sequence lengths
      xg_ref  : (T, B, 4H) f32  pre-projected gate activations x@W_ih + b
      whh_ref : (H, 4H) f32     fused recurrent weights (gate order i,f,g,o)
      out_ref : (T, B, H) f32   per-step hidden outputs (zero at padded steps)
      hfin_ref: (B, H)  f32     final hidden state (packed-seq semantics)
    """
    H = hidden
    B = hfin_ref.shape[0]

    # direction 0 = forward, 1 = backward (time reversed)
    reverse = pl.program_id(0) == 1

    lens = len_ref[...]          # (B, 1) int32 — loaded once, reused every step
    w_hh = whh_ref[...]          # (H, 4H)     — loaded once, lives in vregs

    def step(t, carry):
        h, c = carry
        t_act = jnp.where(reverse, seq_len - 1 - t, t)

        # single fused-gate matmul: (B,H) x (H,4H) -> (B,4H), 4H fills 128 lanes
        gates = xg_ref[t_act] + jnp.dot(h, w_hh, preferred_element_type=jnp.float32)

        i_g = _sigmoid(gates[:, 0 * H:1 * H])
        f_g = _sigmoid(gates[:, 1 * H:2 * H])
        g_g = jnp.tanh(gates[:, 2 * H:3 * H])
        o_g = _sigmoid(gates[:, 3 * H:4 * H])

        c_new = f_g * c + i_g * g_g
        h_new = o_g * jnp.tanh(c_new)

        # packed-sequence emulation: freeze state once t >= length[b]
        mask = t_act < lens                                    # (B, 1) bool
        h_upd = jnp.where(mask, h_new, h)
        c_upd = jnp.where(mask, c_new, c)

        out_ref[t_act] = jnp.where(mask, h_new, jnp.zeros_like(h_new))
        return h_upd, c_upd

    h0 = jnp.zeros((B, H), jnp.float32)
    c0 = jnp.zeros((B, H), jnp.float32)
    h_fin, _ = lax.fori_loop(0, seq_len, step, (h0, c0))
    hfin_ref[...] = h_fin        # written once, after the loop


def bidir_lstm_layer(xg, w_hh, lengths):
    """Both directions of one LSTM layer in a single pallas_call.

    xg     : (2, T, B, 4H) f32  pre-projected gate activations per direction
    w_hh   : (2, H, 4H)    f32  fused recurrent weights per direction
    lengths: (B, 1)        int32
    Returns (out_seq (2,T,B,H), h_fin (2,B,H)).
    """
    _, T, B, G = xg.shape
    H = G // 4

    kernel = functools.partial(_lstm_dir_kernel, seq_len=T, hidden=H)
    out_seq, h_fin = pl.pallas_call(
        kernel,
        out_shape=(jax.ShapeDtypeStruct((2, T, B, H), jnp.float32),
                   jax.ShapeDtypeStruct((2, B, H), jnp.float32)),
        grid_spec=pltpu.PrefetchScalarGridSpec(
            num_scalar_prefetch=0,
            grid=(2,),  # direction axis; independent work -> "parallel" (2 TCs on v7x)
            in_specs=[pl.BlockSpec((B, 1), lambda d: (0, 0)),              # lengths
                      pl.BlockSpec((None, T, B, G), lambda d: (d, 0, 0, 0)),  # xg
                      pl.BlockSpec((None, H, G), lambda d: (d, 0, 0))],       # w_hh
            out_specs=(pl.BlockSpec((None, T, B, H), lambda d: (d, 0, 0, 0)),
                       pl.BlockSpec((None, B, H), lambda d: (d, 0, 0)))),
        compiler_params=pltpu.CompilerParams(dimension_semantics=("parallel",)),
    )(lengths, xg, w_hh)
    return out_seq, h_fin


def rnn_forward(params, text, text_lengths):
    """Equivalent of RNN.forward(text, text_lengths) in eval mode."""
    T, B = text.shape
    lengths = text_lengths.reshape(B, 1).astype(jnp.int32)

    # self.dropout(self.embedding(text)) — dropout is identity in eval mode
    x = jnp.take(params["embedding"], text, axis=0)           # (T, B, E)

    h_fin = None
    for layer in params["lstm"]:
        # Hoisted input projection: one big, fully parallel matmul for the whole
        # sequence and both directions; bias is the combined b_ih + b_hh.
        xg = (jnp.einsum("tbd,ndg->ntbg", x, layer["w_ih"])
              + layer["b"][:, None, None, :])                 # (2, T, B, 4H)
        out, h_fin = bidir_lstm_layer(xg, layer["w_hh"], lengths)
        # inter-layer dropout is identity in eval mode
        x = jnp.concatenate([out[0], out[1]], axis=-1)         # (T, B, 2H)

    # hidden = dropout(cat(hidden[-2], hidden[-1], dim=1)) -> last layer fwd/bwd finals
    # TODO(synk): dropout implemented as eval-mode identity (training-mode RNG masking omitted).
    hidden = jnp.concatenate([h_fin[0], h_fin[1]], axis=1)     # (B, 2H)
    # Final Linear in plain jnp: a pallas_call for a (B,2H)x(2H,O) matmul is pure overhead.
    return hidden @ params["fc_w"] + params["fc_b"]            # (B, O)


def init_params(key, vocab_size, embedding_dim, hidden_dim, output_dim, n_layers, pad_idx):
    keys = iter(jax.random.split(key, 4 + n_layers * 3))
    emb = jax.random.normal(next(keys), (vocab_size, embedding_dim), jnp.float32)
    emb = emb.at[pad_idx].set(0.0)                             # padding_idx row is zero

    stdv = 1.0 / math.sqrt(hidden_dim)
    lstm = []
    for l in range(n_layers):
        d_in = embedding_dim if l == 0 else 2 * hidden_dim
        # fused-gate layout: (direction, d_in, 4H) / (direction, H, 4H); gate order i,f,g,o
        w_ih = jax.random.uniform(next(keys), (2, d_in, 4 * hidden_dim), jnp.float32, -stdv, stdv)
        w_hh = jax.random.uniform(next(keys), (2, hidden_dim, 4 * hidden_dim), jnp.float32, -stdv, stdv)
        b = jax.random.uniform(next(keys), (2, 4 * hidden_dim), jnp.float32, -stdv, stdv)  # b_ih + b_hh
        lstm.append({"w_ih": w_ih, "w_hh": w_hh, "b": b})

    fdim = 2 * hidden_dim
    fstd = 1.0 / math.sqrt(fdim)
    fc_w = jax.random.uniform(next(keys), (fdim, output_dim), jnp.float32, -fstd, fstd)
    fc_b = jax.random.uniform(next(keys), (output_dim,), jnp.float32, -fstd, fstd)

    return {"embedding": emb, "lstm": lstm, "fc_w": fc_w, "fc_b": fc_b}


if __name__ == "__main__":
    VOCAB, EMB, HID, OUT, NLAYERS, PAD = 50, 16, 32, 1, 2, 1
    T, B = 8, 2

    key = jax.random.PRNGKey(0)
    pkey, tkey = jax.random.split(key)
    params = init_params(pkey, VOCAB, EMB, HID, OUT, NLAYERS, PAD)

    # lengths sorted descending (pack_padded_sequence requirement)
    text_lengths = jnp.array([8, 5], dtype=jnp.int32)
    text = jax.random.randint(tkey, (T, B), 0, VOCAB, dtype=jnp.int32)
    t_idx = jnp.arange(T)[:, None]
    text = jnp.where(t_idx < text_lengths[None, :], text, PAD)   # pad beyond each length

    logits = rnn_forward(params, text, text_lengths)
    jax.block_until_ready(logits)
    assert logits.shape == (B, OUT)
    print("KERNEL_OK")
</pallas_src>

<mosaic_0001>
module attributes {stable_mosaic.version = 11 : i64} {
  func.func @_lstm_dir_kernel(%arg0: i32, %arg1: memref<2x1xi32, #tpu.memory_space<vmem>>, %arg2: memref<1x8x2x128xf32, #tpu.memory_space<vmem>>, %arg3: memref<1x32x128xf32, #tpu.memory_space<vmem>>, %arg4: memref<1x8x2x32xf32, #tpu.memory_space<vmem>>, %arg5: memref<1x2x32xf32, #tpu.memory_space<vmem>>) attributes {dimension_semantics = [#tpu.dimension_semantics<parallel>], iteration_bounds = array<i64: 2>, scalar_prefetch = 0 : i64, scratch_operands = 0 : i64, tpu.core_type = #tpu.core_type<tc>, window_params = [{pipeline_mode = #tpu.pipeline_mode<synchronous>, transform_indices = @transform_0, window_bounds = array<i64: 2, 1>}, {transform_indices = @transform_1, window_bounds = array<i64: 1, 8, 2, 128>}, {transform_indices = @transform_2, window_bounds = array<i64: 1, 32, 128>}, {transform_indices = @transform_3, window_bounds = array<i64: 1, 8, 2, 32>}, {transform_indices = @transform_4, window_bounds = array<i64: 1, 2, 32>}]} {
    %c1_i32 = arith.constant 1 : i32
    %0 = arith.cmpi eq, %arg0, %c1_i32 : i32
    %c0 = arith.constant 0 : index
    %c0_0 = arith.constant 0 : index
    %1 = vector.load %arg1[%c0, %c0_0] : memref<2x1xi32, #tpu.memory_space<vmem>>, vector<2x1xi32>
    %c0_1 = arith.constant 0 : index
    %c0_2 = arith.constant 0 : index
    %c0_3 = arith.constant 0 : index
    %2 = vector.load %arg3[%c0_1, %c0_2, %c0_3] : memref<1x32x128xf32, #tpu.memory_space<vmem>>, vector<1x32x128xf32>
    %3 = vector.shape_cast %2 : vector<1x32x128xf32> to vector<32x128xf32>
    %cst = arith.constant 0.000000e+00 : f32
    %4 = vector.broadcast %cst : f32 to vector<2x32xf32>
    %cst_4 = arith.constant 0.000000e+00 : f32
    %5 = vector.broadcast %cst_4 : f32 to vector<2x32xf32>
    %c0_i32 = arith.constant 0 : i32
    %c8_i32 = arith.constant 8 : i32
    %6 = arith.addi %c0_i32, %c8_i32 : i32
    %c1_i32_5 = arith.constant 1 : i32
    %7:2 = scf.for %arg6 = %c0_i32 to %6 step %c1_i32_5 iter_args(%arg7 = %4, %arg8 = %5) -> (vector<2x32xf32>, vector<2x32xf32>)  : i32 {
      %c7_i32 = arith.constant 7 : i32
      %11 = arith.subi %c7_i32, %arg6 : i32
      %12 = arith.select %0, %11, %arg6 : i32
      %c0_10 = arith.constant 0 : index
      %13 = arith.index_cast %12 : i32 to index
      %c0_11 = arith.constant 0 : index
      %c0_12 = arith.constant 0 : index
      %14 = vector.load %arg2[%c0_10, %13, %c0_11, %c0_12] : memref<1x8x2x128xf32, #tpu.memory_space<vmem>>, vector<1x1x2x128xf32>
      %15 = vector.shape_cast %14 : vector<1x1x2x128xf32> to vector<2x128xf32>
      %cst_13 = arith.constant dense<0.000000e+00> : vector<2x128xf32>
      %16 = tpu.matmul %arg7, %3, %cst_13 {dimension_numbers = #tpu.dot_dimension_numbers<[1], [0], [0], [1], [0, 0, 1, 1], [], []>} : vector<2x32xf32>, vector<32x128xf32>, vector<2x128xf32> -> vector<2x128xf32>
      %17 = arith.addf %15, %16 : vector<2x128xf32>
      %18 = vector.extract_strided_slice %17 {offsets = [0, 0], sizes = [2, 32], strides = [1, 1]} : vector<2x128xf32> to vector<2x32xf32>
      %cst_14 = arith.constant 5.000000e-01 : f32
      %19 = vector.broadcast %cst_14 : f32 to vector<2x32xf32>
      %20 = arith.mulf %19, %18 : vector<2x32xf32>
      %21 = math.tanh %20 : vector<2x32xf32>
      %cst_15 = arith.constant 1.000000e+00 : f32
      %22 = vector.broadcast %cst_15 : f32 to vector<2x32xf32>
      %23 = arith.addf %21, %22 : vector<2x32xf32>
      %cst_16 = arith.constant 5.000000e-01 : f32
      %24 = vector.broadcast %cst_16 : f32 to vector<2x32xf32>
      %25 = arith.mulf %24, %23 : vector<2x32xf32>
      %26 = vector.extract_strided_slice %17 {offsets = [0, 32], sizes = [2, 32], strides = [1, 1]} : vector<2x128xf32> to vector<2x32xf32>
      %cst_17 = arith.constant 5.000000e-01 : f32
      %27 = vector.broadcast %cst_17 : f32 to vector<2x32xf32>
      %28 = arith.mulf %27, %26 : vector<2x32xf32>
      %29 = math.tanh %28 : vector<2x32xf32>
      %cst_18 = arith.constant 1.000000e+00 : f32
      %30 = vector.broadcast %cst_18 : f32 to vector<2x32xf32>
      %31 = arith.addf %29, %30 : vector<2x32xf32>
      %cst_19 = arith.constant 5.000000e-01 : f32
      %32 = vector.broadcast %cst_19 : f32 to vector<2x32xf32>
      %33 = arith.mulf %32, %31 : vector<2x32xf32>
      %34 = vector.extract_strided_slice %17 {offsets = [0, 64], sizes = [2, 32], strides = [1, 1]} : vector<2x128xf32> to vector<2x32xf32>
      %35 = math.tanh %34 : vector<2x32xf32>
      %36 = vector.extract_strided_slice %17 {offsets = [0, 96], sizes = [2, 32], strides = [1, 1]} : vector<2x128xf32> to vector<2x32xf32>
      %cst_20 = arith.constant 5.000000e-01 : f32
      %37 = vector.broadcast %cst_20 : f32 to vector<2x32xf32>
      %38 = arith.mulf %37, %36 : vector<2x32xf32>
      %39 = math.tanh %38 : vector<2x32xf32>
      %cst_21 = arith.constant 1.000000e+00 : f32
      %40 = vector.broadcast %cst_21 : f32 to vector<2x32xf32>
      %41 = arith.addf %39, %40 : vector<2x32xf32>
      %cst_22 = arith.constant 5.000000e-01 : f32
      %42 = vector.broadcast %cst_22 : f32 to vector<2x32xf32>
      %43 = arith.mulf %42, %41 : vector<2x32xf32>
      %44 = arith.mulf %33, %arg8 : vector<2x32xf32>
      %45 = arith.mulf %25, %35 : vector<2x32xf32>
      %46 = arith.addf %44, %45 : vector<2x32xf32>
      %47 = math.tanh %46 : vector<2x32xf32>
      %48 = arith.mulf %43, %47 : vector<2x32xf32>
      %49 = vector.broadcast %12 : i32 to vector<2x1xi32>
      %50 = arith.cmpi slt, %49, %1 : vector<2x1xi32>
      %51 = vector.shape_cast %50 : vector<2x1xi1> to vector<2x1xi1>
      %52 = vector.broadcast %51 : vector<2x1xi1> to vector<2x32xi1>
      %53 = arith.select %52, %48, %arg7 : vector<2x32xi1>, vector<2x32xf32>
      %54 = vector.shape_cast %50 : vector<2x1xi1> to vector<2x1xi1>
      %55 = vector.broadcast %54 : vector<2x1xi1> to vector<2x32xi1>
      %56 = arith.select %55, %46, %arg8 : vector<2x32xi1>, vector<2x32xf32>
      %cst_23 = arith.constant 0.000000e+00 : f32
      %57 = vector.broadcast %cst_23 : f32 to vector<2x32xf32>
      %58 = vector.shape_cast %50 : vector<2x1xi1> to vector<2x1xi1>
      %59 = vector.broadcast %58 : vector<2x1xi1> to vector<2x32xi1>
      %60 = arith.select %59, %48, %57 : vector<2x32xi1>, vector<2x32xf32>
      %c0_24 = arith.constant 0 : index
      %61 = arith.index_cast %12 : i32 to index
      %c0_25 = arith.constant 0 : index
      %c0_26 = arith.constant 0 : index
      %62 = vector.load %arg4[%c0_24, %61, %c0_25, %c0_26] : memref<1x8x2x32xf32, #tpu.memory_space<vmem>>, vector<1x1x2x32xf32>
      %63 = vector.shape_cast %62 : vector<1x1x2x32xf32> to vector<2x32xf32>
      %64 = vector.shape_cast %60 : vector<2x32xf32> to vector<1x1x2x32xf32>
      tpu.vector_store %arg4[%c0_24, %61, %c0_25, %c0_26], %64 {strides = array<i32>} : memref<1x8x2x32xf32, #tpu.memory_space<vmem>>, vector<1x1x2x32xf32>,
      scf.yield %53, %56 : vector<2x32xf32>, vector<2x32xf32>
    }
    %c8_i32_6 = arith.constant 8 : i32
    %c0_7 = arith.constant 0 : index
    %c0_8 = arith.constant 0 : index
    %c0_9 = arith.constant 0 : index
    %8 = vector.load %arg5[%c0_7, %c0_8, %c0_9] : memref<1x2x32xf32, #tpu.memory_space<vmem>>, vector<1x2x32xf32>
    %9 = vector.shape_cast %8 : vector<1x2x32xf32> to vector<2x32xf32>
    %10 = vector.shape_cast %7#0 : vector<2x32xf32> to vector<1x2x32xf32>
    tpu.vector_store %arg5[%c0_7, %c0_8, %c0_9], %10 {strides = array<i32>} : memref<1x2x32xf32, #tpu.memory_space<vmem>>, vector<1x2x32xf32>,
    return
  }
  func.func @transform_0(%arg0: i32) -> (i32, i32) {
    %c0_i32 = arith.constant 0 : i32
    %c0_i32_0 = arith.constant 0 : i32
    %c0_i32_1 = arith.constant 0 : i32
    return %c0_i32, %c0_i32_0 : i32, i32
  }
  func.func @transform_1(%arg0: i32) -> (i32, i32, i32, i32) {
    %c0_i32 = arith.constant 0 : i32
    %c0_i32_0 = arith.constant 0 : i32
    %c0_i32_1 = arith.constant 0 : i32
    %c0_i32_2 = arith.constant 0 : i32
    return %arg0, %c0_i32, %c0_i32_0, %c0_i32_1 : i32, i32, i32, i32
  }
  func.func @transform_2(%arg0: i32) -> (i32, i32, i32) {
    %c0_i32 = arith.constant 0 : i32
    %c0_i32_0 = arith.constant 0 : i32
    %c0_i32_1 = arith.constant 0 : i32
    return %arg0, %c0_i32, %c0_i32_0 : i32, i32, i32
  }
  func.func @transform_3(%arg0: i32) -> (i32, i32, i32, i32) {
    %c0_i32 = arith.constant 0 : i32
    %c0_i32_0 = arith.constant 0 : i32
    %c0_i32_1 = arith.constant 0 : i32
    %c0_i32_2 = arith.constant 0 : i32
    return %arg0, %c0_i32, %c0_i32_0, %c0_i32_1 : i32, i32, i32, i32
  }
  func.func @transform_4(%arg0: i32) -> (i32, i32, i32) {
    %c0_i32 = arith.constant 0 : i32
    %c0_i32_0 = arith.constant 0 : i32
    %c0_i32_1 = arith.constant 0 : i32
    return %arg0, %c0_i32, %c0_i32_0 : i32, i32, i32
  }
}

</mosaic_0001>

<bundles_post_ra>
// kernel: tpu_custom_call.1
= control target key start
LH: loop header
LB: loop body
LE: loop exit
PB: predicated region body
PF: predicated region fallthrough
CT: control target
= control target key end

     0   :  { %10 = vsyncpa [#allocation3], 0  ;;  %s1246_s0 = inlined_call_operand.vmem [shape: s32[2,1], index: 0, kind: input, shape index: {}]   ;;  %s1247_s1 = inlined_call_operand.hbm [shape: f32[2,8,2,128], index: 1, kind: input, shape index: {}]   ;;  %s1248_s2 = inlined_call_operand.hbm [shape: f32[2,32,128], index: 2, kind: input, shape index: {}]   ;;  %s1249_s3 = inlined_call_operand.hbm [shape: f32[2,8,2,32], index: 3, kind: output, shape index: {0}]   ;;  %s1250_s4 = inlined_call_operand.hbm [shape: f32[2,2,32], index: 4, kind: output, shape index: {1}]  }
   0x1   :  { %12 = vsyncpa [#allocation3 + $0x1], 0 }
   0x2   :  { %13 = vsyncpa [#allocation6], 0 }
   0x3   :  { %15 = vsyncpa [#allocation6 + $0x1], 0 }
   0x4   :  { %16 = vsyncpa [#allocation4], 0 }
   0x5   :  { %18 = vsyncpa [#allocation4 + $0x1], 0 }
   0x6   :  { %19 = vsyncpa [#allocation9], 0 }
   0x7   :  { %21 = vsyncpa [#allocation9 + $0x1], 0  ;;  %s944_s15 = smov 0   ;;  %s946_s16 = smov 0  }
   0x8   :  { %s948_s17 = smov 0   ;;  %s950_s18 = smov 0  }
   0x9 LB: > { %s965_s19 = sadd.s32 4294967295, %s890_s18   ;;  %s583_s20 = sadd.s32 4294967294, %s890_s18   ;;  %s890_s18 = sphi %s950_s18, %s1269_s18   ;;  %s886_s17 = sphi %s948_s17, %s1268_s17   ;;  %s882_s16 = sphi %s946_s16, %s1267_s16   ;;  %s878_s15 = sphi %s944_s15, %s1266_s15  }
   0xa   : > { %s969_s21 = sadd.s32 1, %s890_s18   ;;  %s55_s22 = sadd.s32 1, %s886_s17 }
   0xb   : > { %s52_s23 = ssub.s32 %s890_s18, %s969_s21  ;;  %p62_p0 = scmp.ne.s32.totalorder %s886_s17, %s882_s16 }
   0xc   : > { %p53_p1 = scmp.eq.s32.totalorder %s52_s23, 0  ;;  %p63_p2 = scmp.eq.s32.totalorder %s890_s18, 0 }
   0xd   : > { %p68_p3 = scmp.ne.s32.totalorder %s882_s16, %s878_s15  ;;  %p69_p4 = scmp.eq.s32.totalorder %s965_s19, 0 }
   0xe   : > { %s981_s24 = scalar_select %p53_p1, %s886_s17, %s55_s22  }
   0xf   : > { %p983_p5 = por %p63_p2, %p62_p0  ;;  %p987_p6 = por %p69_p4, %p68_p3 }
  0x10   : > { %p1251_p7 = scmp.eq.s32.totalorder %s965_s19, 1  ;;  %p124_p8 = scmp.eq.s32.totalorder %s583_s20, 1 }
  0x11   : > { %s1255_s26 = scalar_select %p987_p6, 1, 0 }
  0x12   : > { %p647_p10 = scmp.lt.s32.totalorder %s890_s18, 2  ;;  %p996_p11 = por %p1251_p7, %p62_p0 }
  0x13   : > { %p1000_p12 = por %p124_p8, %p68_p3  ;;  %s1005_s29 = sand.u32 1, %s886_s17  }
  0x14   : > { %s1256_s27 = scalar_select %p996_p11, 1, 0 }
  0x15   : > { %s1257_s28 = scalar_select %p1000_p12, 1, 0 }
  0x16   : > { %s606_s30 = sshll.u32 %s890_s18, 8  ;;  %s586_s5 = sshll.u32 %s1005_s29, 4 }
  0x17   : > { %s1012_s8 = scalar_lea.hbm %s1247_s1, %s606_s30  ;;  %s177_s9 = scalar_lea.vmem [#allocation2], %s586_s5 }
  0x18   : > { %s184_s10 = sshll.u32 %s177_s9, 4  ;;  %p1016_p13 = pnand %p647_p10, %p983_p5  ;;  %s1020_s10 = int_to_ptr.vmem [resolvable:$true] %s184_s10 }
  0x19   : > { %s174_s12 = scalar_lea.sflag [#allocation3], %s1005_s29  ;;  %s724_s13 = scalar_lea.hbm %s1012_s8, 256 }
  0x1a   : > { %p725_p0 = scmp.ne.s32.totalorder %s1012_s8, %s724_s13  ;;  %p726_p1 = pneg %p1016_p13 }
  0x1b   : > { %s729_s22 = scalar_lea.hbm %s1247_s1, 512  ;;  %p730_p4 = scmp.lt.s32.totalorder %s1012_s8, %s1247_s1 }
  0x1c   : > { %p727_p2 = pnand %p726_p1, %p725_p0  ;;  %p731_p5 = scmp.lt.s32.totalorder %s729_s22, %s724_s13 }
  0x1e   : > { %p728_p3 = pneg %p727_p2  ;;  %p732_p8 = por %p731_p5, %p730_p4 }
  0x20   : > { %p733_p10 = pnand %p732_p8, %p728_p3 }
  0x22   : > { %736 = shalt.err (!%p733_p10)
}
  0x23   : > { %s737_s30 = scalar_lea.vmem %s1020_s10, 256  ;;  %s904_s5 = smov [#allocation2]  }
  0x24   : > { %p738_p9 = scmp.ne.s32.totalorder %s1020_s10, %s737_s30  ;;  %s742_s6 = sshll.u32 %s904_s5, 4  ;;  %s743_s6 = int_to_ptr.vmem [resolvable:$false] %s742_s6 }
  0x25   : > { %s744_s7 = scalar_lea.vmem %s743_s6, 512  ;;  %p745_p7 = scmp.lt.s32.totalorder %s1020_s10, %s743_s6 }
  0x26   : > { %p740_p0 = pnand %p738_p9, %p726_p1  ;;  %p746_p12 = scmp.lt.s32.totalorder %s744_s7, %s737_s30 }
  0x28   : > { %p741_p2 = pneg %p740_p0  ;;  %p747_p11 = por %p746_p12, %p745_p7 }
  0x2a   : > { %p748_p4 = pnand %p747_p11, %p741_p2 }
  0x2c   : > { %751 = shalt.err (!%p748_p4)
}
  0x2d   : > { %s905_s9 = smov 32   ;;  %s906_s13 = smov 2  }
  0x2e   : > { %636 = dma.hbm_to_vmem [thread:$0]  (!%p1016_p13), %s1012_s8, 256, %s1020_s10, %s174_s12, %s905_s9, %s905_s9, %s906_s13  }
  0x2f   : > { %p592_p9 = scmp.ge.s32.totalorder %s890_s18, 1  ;;  %p213_p3 = scmp.lt.s32.totalorder %s890_s18, 3 }
  0x30   : > { %s589_s14 = sshll.u32 %s1005_s29, 5  ;;  %s607_s22 = sshll.u32 %s890_s18, 9 }
  0x31   : > { %p1052_p7 = pnand %p592_p9, %p213_p3  ;;  %s198_s23 = scalar_lea.vmem [#allocation5], %s589_s14 }
  0x32   : > { %s205_s25 = sshll.u32 %s198_s23, 4  ;;  %s1060_s6 = scalar_lea.hbm %s1248_s2, %s607_s22  ;;  %s1062_s25 = int_to_ptr.vmem [resolvable:$true] %s205_s25 }
  0x33   : > { %s195_s8 = scalar_lea.sflag [#allocation6], %s1005_s29  ;;  %s752_s10 = scalar_lea.hbm %s1060_s6, 512 }
  0x34   : > { %p753_p11 = scmp.ne.s32.totalorder %s1060_s6, %s752_s10  ;;  %s757_s9 = scalar_lea.hbm %s1248_s2, 1024 }
  0x35   : > { %p758_p8 = scmp.lt.s32.totalorder %s1060_s6, %s1248_s2  ;;  %p759_p10 = scmp.lt.s32.totalorder %s757_s9, %s752_s10 }
  0x36   : > { %p755_p12 = pnand %p753_p11, %p726_p1 }
  0x37   : > { %p760_p0 = por %p759_p10, %p758_p8 }
  0x38   : > { %p756_p5 = pneg %p755_p12 }
  0x3a   : > { %p761_p2 = pnand %p760_p0, %p756_p5 }
  0x3c   : > { %764 = shalt.err (!%p761_p2)
}
  0x3d   : > { %s765_s22 = scalar_lea.vmem %s1062_s25, 512  ;;  %s907_s23 = smov [#allocation5]  }
  0x3e   : > { %p766_p4 = scmp.ne.s32.totalorder %s1062_s25, %s765_s22  ;;  %s770_s30 = sshll.u32 %s907_s23, 4  ;;  %s771_s30 = int_to_ptr.vmem [resolvable:$false] %s770_s30 }
  0x3f   : > { %s772_s5 = scalar_lea.vmem %s771_s30, 1024  ;;  %p773_p11 = scmp.lt.s32.totalorder %s1062_s25, %s771_s30 }
  0x40   : > { %p768_p9 = pnand %p766_p4, %p726_p1  ;;  %p774_p12 = scmp.lt.s32.totalorder %s772_s5, %s765_s22 }
  0x42   : > { %p769_p3 = pneg %p768_p9  ;;  %p775_p6 = por %p774_p12, %p773_p11 }
  0x44   : > { %p776_p8 = pnand %p775_p6, %p769_p3 }
  0x46   : > { %779 = shalt.err (!%p776_p8)
}
  0x47   : > { %s908_s10 = smov 128   ;;  %s909_s12 = smov 8  }
  0x48   : > { %639 = dma.hbm_to_vmem [thread:$0]  (!%p1016_p13), %s1060_s6, 512, %s1062_s25, %s195_s8, %s908_s10, %s908_s10, %s909_s12  }
  0x49   : > { %217 = sbr.rel (%p1052_p7) target bundleno = 929 (0x3a1), region = 32  ;;  %s1092_s7 = sand.u32 (!%p1052_p7), 1, %s882_s16  }
  0x4a   : > { %s593_s9 = sshll.u32 (!%p1052_p7), %s1092_s7, 4  ;;  %s220_s13 = scalar_lea.sflag (!%p1052_p7), [#allocation3], %s1092_s7 }
  0x4b   : > { %s1096_s14 = scalar_lea.vmem (!%p1052_p7), [#allocation2], %s593_s9  ;;  %p1260_p6 = scmp.ne.s32.totalorder (!%p1052_p7), %s1255_s26, 0 }
  0x4e   : > { %861 = dma.done.wait (%p1260_p6), %s220_s13, 256  }
  0x4f   : > { %863 = vsyncadd (%p1260_p6), %s220_s13, 4294967040  ;;  %s594_s29 = sshll.u32 %s1092_s7, 5  ;;  %s229_s11 = scalar_lea.sflag [#allocation6], %s1092_s7 }
  0x50   : > { %s232_s20 = scalar_lea.vmem [#allocation5], %s594_s29 }
  0x51   : > { %865 = dma.done.wait (%p1260_p6), %s229_s11, 512  }
  0x52   : > { %867 = vsyncadd (%p1260_p6), %s229_s11, 4294966784  ;;  %s596_s25 = sshll.u32 %s1092_s7, 1  ;;  %v1112_v0 = vld [vmem:[%s1246_s0] sm:$0x3]  ;;  %v1116_v2 = vld [vmem:[%s232_s20 + $0x8] sm:$0xff]  ;;  %s1122_s22 = scalar_lea.vmem [#allocation7], %s593_s9 }
  0x53   : > { %v1114_v1 = vld [vmem:[%s232_s20] sm:$0xff]  ;;  %v1118_v3 = vld [vmem:[%s232_s20 + $0x10] sm:$0xff]  ;;  %v1120_v4 = vld [vmem:[%s232_s20 + $0x18] sm:$0xff]  ;;  %s1124_s23 = scalar_lea.vmem [#allocation8], %s596_s25  ;;  %v1126_v5 = vmov 0.0   ;;  %v1128_v6 = vmov 0.0  }
  0x54   : > { %s1130_s26 = smov 0  }
  0x55 LB: >> { %v910_v7 = vmov 0.0   ;;  %vm911_vm0 = vmmov 0   ;;  %s912_s30 = smov 32   ;;  %vm289_vm1 = vcmask 261120   ;;  %s281_s5 = ssub.s32 7, %s902_s26  ;;  %v913_v13 = vmov 0   ;;  %s902_s26 = sphi %s1130_s26, %s278_s26   ;;  %v898_v6 = vphi %v1128_v6, %v1262_v6   ;;  %v894_v5 = vphi %v1126_v5, %v393_v5  }
  0x56   : >> { %614 = vmatprep.subr.mxu0 %v910_v7  ;;  %622 = vmatprep.mubr.msk.f32.mxu0 %vm911_vm0, %v910_v7  ;;  %p1261_p13 = scmp.eq.s32.totalorder %s965_s19, 1  ;;  %s914_s9 = smov 64   ;;  %vm400_vm4 = vcmask 254976  }
  0x57   : >> { %287 = vrot.lane.b32.xlu0 %v898_v6, %s912_s30  ;;  %615 = vmatpush3.msra.mxu0 %v1120_v4 }
  0x58   : >> { %616 = vmatprep.subr.mxu0 %v910_v7  ;;  %s1271_s5 = smov (!%p1261_p13, %s281_s5), %s902_s26  ;;  %716 = vset.pattern.permute.xlu1 %v913_v13  ;;  %s278_s26 = sadd.s32 1, %s902_s26  }
  0x59   : >> { %617 = vmatpush3.msra.mxu0 %v1118_v3  ;;  %s597_s10 = sshll.u32 %s1271_s5, 1  ;;  %717 = vset.pattern.permute.xlu0 %v913_v13  ;;  %v385_v18 = vstv %s1271_s5  ;;  %p275_p1 = scmp.ge.s32.totalorder %s278_s26, 8  }
  0x5a   : >> { %618 = vmatprep.subr.mxu0 %v910_v7  ;;  %s284_s12 = scalar_lea.vmem %s1096_s14, %s597_s10 [#allocation2]  ;;  %vm386_vm2 = vcmp.lt.s32.totalorder %v385_v18, %v1112_v0  ;;  %s399_s13 = scalar_lea.vmem %s1122_s22, %s597_s10 [#allocation7] }
  0x5b   : >> { %619 = vmatpush3.msra.mxu0 %v1116_v2  ;;  %v285_v9 = vld [vmem:[%s284_s12] sm:$0x3]  ;;  %v387_v22 = vsel %vm386_vm2, 1, %v913_v13  ;;  %s915_s29 = smov (%p275_p1), 32   ;;  %s608_s11 = sshll.u32 (%p275_p1), %s965_s19, 8 }
  0x5c   : >> { %620 = vmatprep.subr.mxu0 %v910_v7  ;;  %s427_s20 = sshll.u32 (%p275_p1), %s1122_s22, 4  ;;  %s1173_s8 = scalar_lea.hbm (%p275_p1), %s1249_s3, %s608_s11  ;;  %s1175_s20 = int_to_ptr.vmem [resolvable:$true] %s427_s20 }
  0x5d   : >> { %621 = vmatpush3.msra.mxu0 %v1114_v1  ;;  %s409_s26 = scalar_lea.sflag (%p275_p1), [#allocation4], %s1092_s7  ;;  %s780_s14 = scalar_lea.vmem (%p275_p1), %s1175_s20, 256 }
  0x5e   : > { %p781_p7 = scmp.ne.s32.totalorder (%p275_p1), %s1175_s20, %s780_s14  ;;  %p1263_p5 = scmp.ne.s32.totalorder (%p275_p1), %s1256_s27, 0 }
  0x60   : > { %p782_p10 = pnand (%p275_p1), %p781_p7, %p1263_p5 }
  0x62   : > { %p783_p0 = pneg (%p275_p1), %p782_p10 }
  0xc9   : >> { %v288_v8 = vpop.permute.xlu0 %287 }
  0xca   : >> { %623 = vmatmul.mubr.msk.f32.vlgmr.msra.gmra.mxu0 %vm289_vm1, %v288_v8 }
 0x18a   : >> { %v358_v10 = vpop.f32.mrf.mxu0 }
 0x18b   : >> { %v362_v11 = vadd.f32 %v358_v10, %v285_v9 }
 0x18c   : >> { %v624_v12 = vpop.f32.mrf.mxu0 }
 0x18d   : >> { %718 = vtanh.f32 %v362_v11  ;;  %v363_v15 = vmul.f32 0.5, %v362_v11 }
 0x18f   : >> { %720 = vtanh.f32 %v363_v15 }
 0x19a   : >> { %v719_v14 = vpop.eup %718 }
 0x19b   : >> { %370 = vrot.lane.b32.xlu0 %v719_v14, %s914_s9 }
 0x19c   : >> { %v721_v16 = vpop.eup %720 }
 0x19d   : >> { %v365_v17 = vadd.f32 1.0, %v721_v16 }
 0x19f   : >> { %v366_v19 = vmul.f32 0.5, %v365_v17 }
 0x1a1   : >> { %v368_v23 = vmul.f32 %v894_v5, %v366_v19 }
 0x20d   : >> { %v371_v20 = vpop.permute.xlu0 %370 }
 0x20e   : >> { %v373_v21 = vmul.f32 %v371_v20, %v366_v19 }
 0x210   : >> { %375 = vrot.lane.b32.xlu1 %v373_v21, %s912_s30 }
 0x214   : >> { %389 = vperm.xlu1 %716, %v387_v22  }
 0x282   : >> { %v376_v24 = vpop.permute.xlu1 %375 }
 0x283   : >> { %v378_v25 = vadd.f32 %v376_v24, %v368_v23 }
 0x285   : >> { %722 = vtanh.f32 %v378_v25 }
 0x28f   : >> { %v390_v26 = vpop.permute.xlu1 %389 }
 0x290   : >> { %vm391_vm3 = vcmp.eq.s32.totalorder %v390_v26, 1 }
 0x291   : >> { %v393_v5 = vsel %vm391_vm3, %v378_v25, %v894_v5  }
 0x292   : >> { %v723_v27 = vpop.eup %722 }
 0x293   : >> { %381 = vrot.lane.b32.xlu0 %v723_v27, %s914_s9 }
 0x305   : >> { %v382_v28 = vpop.permute.xlu0 %381 }
 0x306   : >> { %v384_v29 = vmul.f32 %v382_v28, %v366_v19 }
 0x308   : >> { %v392_v30 = vsel %vm391_vm3, %v384_v29, %v898_v6   ;;  %v394_v31 = vsel %vm391_vm3, %v384_v29, 0.0 }
 0x309   : >> { %396 = vrot.lane.b32.xlu1 %v394_v31, %s912_s30  ;;  %v1262_v6 = vmov %v392_v30  ;;  %403 = vrot.lane.b32.xlu0 (%p275_p1), %v392_v30, %s915_s29  ;;  %s916_s30 = smov (%p275_p1), [#allocation7]  }
 0x30a   : > { %s784_s5 = sshll.u32 (%p275_p1), %s916_s30, 4  ;;  %s785_s5 = int_to_ptr.vmem [resolvable:$false] %s784_s5 }
 0x30b   : > { %s786_s22 = scalar_lea.vmem (%p275_p1), %s785_s5, 512  ;;  %p787_p2 = scmp.lt.s32.totalorder (%p275_p1), %s1175_s20, %s785_s5 }
 0x30c   : > { %p788_p4 = scmp.lt.s32.totalorder (%p275_p1), %s786_s22, %s780_s14 }
 0x30e   : > { %p789_p9 = por (%p275_p1), %p788_p4, %p787_p2 }
 0x310   : > { %p790_p3 = pnand (%p275_p1), %p789_p9, %p783_p0 }
 0x378   : > { %277 = sbr.rel (!%p275_p1) target bundleno = 85 (0x55), region = 116 }
 0x37b   : >> { %v397_v32 = vpop.permute.xlu1 %396 }
 0x37c   : >> { %401 = vst.msk [vmem:[%s399_s13] sm:$0x3] %vm400_vm4, %v397_v32 }
 0x37d   : > { %793 = shalt.err (!%p790_p3)
}
 0x37e   : > { %s794_s10 = scalar_lea.hbm %s1173_s8, 256  ;;  %s798_s13 = scalar_lea.hbm %s1249_s3, 512 }
 0x37f   : > { %p795_p11 = scmp.ne.s32.totalorder %s1173_s8, %s794_s10  ;;  %p799_p6 = scmp.lt.s32.totalorder %s1173_s8, %s1249_s3 }
 0x380   : > { %p800_p13 = scmp.lt.s32.totalorder %s798_s13, %s794_s10 }
 0x381   : > { %p796_p12 = pnand %p795_p11, %p1263_p5 }
 0x382   : > { %p801_p1 = por %p800_p13, %p799_p6 }
 0x383   : > { %p797_p8 = pneg %p796_p12 }
 0x385   : > { %p802_p7 = pnand %p801_p1, %p797_p8 }
 0x387   : > { %805 = shalt.err (!%p802_p7)
}
 0x388   : > { %s917_s6 = smov 2   ;;  %s603_s14 = sshll.u32 %s965_s19, 5  ;;  %v404_v33 = vpop.permute.xlu0 %403 }
 0x389   : > { %629 = dma.vmem_to_hbm [thread:$0]  (%p1263_p5), %s1175_s20, 256, %s1173_s8, %s409_s26, %s915_s29, %s915_s29, %s917_s6  }
 0x38a   : > { %s443_s30 = sshll.u32 %s1124_s23, 4  ;;  %s1207_s10 = scalar_lea.hbm %s1250_s4, %s603_s14  ;;  %407 = vst.msk [vmem:[%s1124_s23] sm:$0x3] %vm400_vm4, %v404_v33  ;;  %s444_s30 = int_to_ptr.vmem [resolvable:$true] %s443_s30 }
 0x38b   : > { %s414_s12 = scalar_lea.sflag [#allocation9], %s1092_s7  ;;  %s806_s9 = scalar_lea.vmem %s444_s30, 32 }
 0x38c   : > { %p807_p10 = scmp.ne.s32.totalorder %s444_s30, %s806_s9  ;;  %s918_s13 = smov [#allocation8]  }
 0x38d   : > { %s810_s11 = sshll.u32 %s918_s13, 4  ;;  %s811_s11 = int_to_ptr.vmem [resolvable:$false] %s810_s11 }
 0x38e   : > { %p808_p0 = pnand %p807_p10, %p1263_p5  ;;  %s812_s19 = scalar_lea.vmem %s811_s11, 64 }
 0x38f   : > { %p813_p4 = scmp.lt.s32.totalorder %s444_s30, %s811_s11  ;;  %p814_p9 = scmp.lt.s32.totalorder %s812_s19, %s806_s9 }
 0x390   : > { %p809_p2 = pneg %p808_p0 }
 0x391   : > { %p815_p3 = por %p814_p9, %p813_p4 }
 0x393   : > { %p816_p11 = pnand %p815_p3, %p809_p2 }
 0x395   : > { %819 = shalt.err (!%p816_p11)
}
 0x396   : > { %s820_s23 = scalar_lea.hbm %s1207_s10, 32  ;;  %s824_s20 = scalar_lea.hbm %s1250_s4, 64 }
 0x397   : > { %p821_p12 = scmp.ne.s32.totalorder %s1207_s10, %s820_s23  ;;  %p825_p13 = scmp.lt.s32.totalorder %s1207_s10, %s1250_s4 }
 0x398   : > { %p826_p1 = scmp.lt.s32.totalorder %s824_s20, %s820_s23 }
 0x399   : > { %p822_p8 = pnand %p821_p12, %p1263_p5 }
 0x39a   : > { %p827_p7 = por %p826_p1, %p825_p13 }
 0x39b   : > { %p823_p6 = pneg %p822_p8 }
 0x39d   : > { %p828_p10 = pnand %p827_p7, %p823_p6 }
 0x39f   : > { %831 = shalt.err (!%p828_p10)
}
 0x3a0   : > { %630 = dma.vmem_to_hbm [thread:$0]  (%p1263_p5), %s444_s30, 32, %s1207_s10, %s414_s12  }
 0x3a1 PF: > { %s455_s25 = sand.u32 1, %s878_s15   ;;  %p1264_p0 = scmp.ne.s32.totalorder %s1257_s28, 0 }
 0x3a2   : > { %p1265_p2 = scmp.ge.s32.totalorder %s890_s18, 2  ;;  %s456_s6 = scalar_lea.sflag [#allocation4], %s455_s25 }
 0x3a4   : > { %p641_p4 = pnand %p1265_p2, %p1264_p0 }
 0x3a6   : > { %p642_p9 = pneg %p641_p4 }
 0x3a8   : > { %869 = dma.done.wait (%p642_p9), %s456_s6, 256  }
 0x3a9   : > { %871 = vsyncadd (%p642_p9), %s456_s6, 4294967040  ;;  %s465_s14 = scalar_lea.sflag [#allocation9], %s455_s25 }
 0x3aa   : > { %873 = dma.done.wait (%p642_p9), %s465_s14, 32  }
 0x3ab   : > { %875 = vsyncadd (%p642_p9), %s465_s14, 4294967264  ;;  %p24_p5 = scmp.ge.s32.totalorder %s969_s21, 4   ;;  %s1266_s15 = smov %s882_s16 }
 0x3ac   : > { %s1267_s16 = smov %s886_s17  ;;  %s1268_s17 = smov %s981_s24 }
 0x3ad   : > { %s1269_s18 = smov %s969_s21  ;;  %26 = sbr.rel (!%p24_p5) target bundleno = 9 (0x9), region = 127 }
 0x3b2   :  { %470 = vsyncpa [#allocation3], 1 }
 0x3b3   :  { %472 = vsyncpa [#allocation3 + $0x1], 1 }
 0x3b4   :  { %473 = vsyncpa [#allocation6], 1 }
 0x3b5   :  { %475 = vsyncpa [#allocation6 + $0x1], 1 }
 0x3b6   :  { %476 = vsyncpa [#allocation4], 1 }
 0x3b7   :  { %478 = vsyncpa [#allocation4 + $0x1], 1 }
 0x3b8   :  { %479 = vsyncpa [#allocation9], 1 }
 0x3b9   :  { %481 = vsyncpa [#allocation9 + $0x1], 1 }

</bundles_post_ra>
